<compile_context>
chip_gen: v7x
topology: tpu7x:2x2x1
jax: 0.10.0
libtpu: 0.0.40
codegen_flags: <defaults>
</compile_context>

<pallas_src>
import functools
import numpy as np

import jax
import jax.numpy as jnp
from jax import lax
from jax.experimental import pallas as pl
from jax.experimental.pallas import tpu as pltpu


# --------------------------------------------------------------------------
# helpers
# --------------------------------------------------------------------------
def _tile(dim, target, align):
    """Largest tile <= target that is a multiple of `align` and divides `dim`,
    falling back to the full dim (valid per the 'equal full dim' rule)."""
    if dim <= target:
        return dim
    t = (target // align) * align
    while t >= align:
        if dim % t == 0:
            return t
        t -= align
    return dim


# --------------------------------------------------------------------------
# generic tiled linear:  x [M, K] @ w [K, N] + b [1, N]
# --------------------------------------------------------------------------
def _linear_kernel(x_ref, w_ref, b_ref, o_ref, acc_ref):
    k = pl.program_id(2)

    @pl.when(k == 0)
    def _():
        acc_ref[...] = jnp.zeros_like(acc_ref)

    acc_ref[...] += jnp.dot(x_ref[...], w_ref[...],
                            preferred_element_type=jnp.float32)

    @pl.when(k == pl.num_programs(2) - 1)
    def _():
        o_ref[...] = (acc_ref[...] + b_ref[...]).astype(o_ref.dtype)


def pallas_linear(x, w, b, *, out_dtype, tm=256, tn=256, tkk=512):
    M, K = x.shape
    N = w.shape[1]
    tm = _tile(M, tm, 8)
    tn = _tile(N, tn, 128)
    tkk = _tile(K, tkk, 128)
    grid = (M // tm, N // tn, K // tkk)
    return pl.pallas_call(
        _linear_kernel,
        grid=grid,
        in_specs=[
            pl.BlockSpec((tm, tkk), lambda i, j, k: (i, k)),
            pl.BlockSpec((tkk, tn), lambda i, j, k: (k, j)),
            pl.BlockSpec((1, tn), lambda i, j, k: (0, j)),
        ],
        out_specs=pl.BlockSpec((tm, tn), lambda i, j, k: (i, j)),
        out_shape=jax.ShapeDtypeStruct((M, N), out_dtype),
        scratch_shapes=[pltpu.VMEM((tm, tn), jnp.float32)],
        compiler_params=pltpu.CompilerParams(
            dimension_semantics=("parallel", "parallel", "arbitrary")),
    )(x, w, b)


# --------------------------------------------------------------------------
# fused query-side projection:
#   q = x @ Wq^T + bq            (columns 0:E of wqc)
#   c = tanh(x @ Wlocal^T) @ Wg  (columns E:2E of wqc, then the gate proj)
# --------------------------------------------------------------------------
def _qproj_kernel(x_ref, wqc_ref, bq_ref, wg_ref, q_ref, c_ref, acc_ref,
                  *, embed_dim):
    k = pl.program_id(1)

    @pl.when(k == 0)
    def _():
        acc_ref[...] = jnp.zeros_like(acc_ref)

    acc_ref[...] += jnp.dot(x_ref[...], wqc_ref[...],
                            preferred_element_type=jnp.float32)

    @pl.when(k == pl.num_programs(1) - 1)
    def _():
        E = embed_dim
        acc = acc_ref[...]
        q_ref[...] = (acc[:, :E] + bq_ref[...]).astype(q_ref.dtype)
        lp = jnp.tanh(acc[:, E:])
        c_ref[...] = jnp.dot(lp.astype(wg_ref.dtype), wg_ref[...],
                             preferred_element_type=jnp.float32
                             ).astype(c_ref.dtype)


def pallas_qproj(x, wqc, bq, wg, *, out_dtype, tm=256, tkk=512):
    M, K = x.shape
    twoE = wqc.shape[1]
    E = bq.shape[1]
    H = wg.shape[1]
    tm = _tile(M, tm, 8)
    tkk = _tile(K, tkk, 128)
    grid = (M // tm, K // tkk)
    kern = functools.partial(_qproj_kernel, embed_dim=E)
    return pl.pallas_call(
        kern,
        grid=grid,
        in_specs=[
            pl.BlockSpec((tm, tkk), lambda i, k: (i, k)),
            pl.BlockSpec((tkk, twoE), lambda i, k: (k, 0)),
            pl.BlockSpec((1, E), lambda i, k: (0, 0)),
            pl.BlockSpec((K, H), lambda i, k: (0, 0)),
        ],
        out_specs=[
            pl.BlockSpec((tm, E), lambda i, k: (i, 0)),
            pl.BlockSpec((tm, H), lambda i, k: (i, 0)),
        ],
        out_shape=(
            jax.ShapeDtypeStruct((M, E), out_dtype),
            jax.ShapeDtypeStruct((M, H), jnp.float32),
        ),
        scratch_shapes=[pltpu.VMEM((tm, twoE), jnp.float32)],
        compiler_params=pltpu.CompilerParams(
            dimension_semantics=("parallel", "arbitrary")),
    )(x, wqc, bq, wg)


# --------------------------------------------------------------------------
# fused key/value projection:  [k | v] = x @ [Wk|Wv]^T + [bk|bv]
# --------------------------------------------------------------------------
def _kvproj_kernel(x_ref, w_ref, b_ref, k_ref, v_ref, acc_ref, *, embed_dim):
    kk = pl.program_id(1)

    @pl.when(kk == 0)
    def _():
        acc_ref[...] = jnp.zeros_like(acc_ref)

    acc_ref[...] += jnp.dot(x_ref[...], w_ref[...],
                            preferred_element_type=jnp.float32)

    @pl.when(kk == pl.num_programs(1) - 1)
    def _():
        E = embed_dim
        acc = acc_ref[...] + b_ref[...]
        k_ref[...] = acc[:, :E].astype(k_ref.dtype)
        v_ref[...] = acc[:, E:].astype(v_ref.dtype)


def pallas_kvproj(x, wkv, bkv, *, out_dtype, tm=256, tkk=512):
    M, K = x.shape
    twoE = wkv.shape[1]
    E = twoE // 2
    tm = _tile(M, tm, 8)
    tkk = _tile(K, tkk, 128)
    grid = (M // tm, K // tkk)
    kern = functools.partial(_kvproj_kernel, embed_dim=E)
    return pl.pallas_call(
        kern,
        grid=grid,
        in_specs=[
            pl.BlockSpec((tm, tkk), lambda i, k: (i, k)),
            pl.BlockSpec((tkk, twoE), lambda i, k: (k, 0)),
            pl.BlockSpec((1, twoE), lambda i, k: (0, 0)),
        ],
        out_specs=[
            pl.BlockSpec((tm, E), lambda i, k: (i, 0)),
            pl.BlockSpec((tm, E), lambda i, k: (i, 0)),
        ],
        out_shape=(
            jax.ShapeDtypeStruct((M, E), out_dtype),
            jax.ShapeDtypeStruct((M, E), out_dtype),
        ),
        scratch_shapes=[pltpu.VMEM((tm, twoE), jnp.float32)],
        compiler_params=pltpu.CompilerParams(
            dimension_semantics=("parallel", "arbitrary")),
    )(x, wkv, bkv)


# --------------------------------------------------------------------------
# local (gaussian-gated) multi-head attention: all heads of one batch per step
# --------------------------------------------------------------------------
def _attn_kernel(q_ref, k_ref, v_ref, c_ref, m_ref, o_ref, w_ref, *,
                 scaling, inv_demon, approx_recip):
    tq, _, H, hd = q_ref.shape
    tk = k_ref.shape[0]

    q = q_ref[...]                       # [tq, 1, H, hd]
    k = k_ref[...]                       # [tk, 1, H, hd]
    v = v_ref[...]                       # [tk, 1, H, hd]
    c_raw = c_ref[0]                     # [tq, H]  f32 (pre-src_len centres)
    mask = m_ref[0]                      # [1, tk]  f32 (1.0 == padded key)

    # effective source length, fused here instead of an extra XLA pass
    src_len = jnp.float32(tk) - jnp.sum(mask, axis=-1, keepdims=True)   # [1, 1]
    centers = c_raw.astype(jnp.float32) * src_len                       # [tq, H]

    pad = mask > 0.5                     # [1, tk]
    neg_big = jnp.float32(-1e30)         # finite -> no NaN for fully padded rows
    j_pos = lax.broadcasted_iota(jnp.float32, (tq, tk), 1)  # hoisted once/block

    outs = []
    w_acc = jnp.zeros((tq, tk), jnp.float32)
    for h in range(H):                   # static unroll over heads
        qh = q[:, 0, h, :]               # [tq, hd]
        kh = k[:, 0, h, :]               # [tk, hd]
        vh = v[:, 0, h, :]               # [tk, hd]

        s = jnp.dot(qh, kh.T, preferred_element_type=jnp.float32) * scaling
        s = jnp.where(pad, neg_big, s)   # [tq, tk]

        m = jnp.max(s, axis=-1, keepdims=True)
        p = jnp.exp(s - m)
        inv_den = pl.reciprocal(jnp.sum(p, axis=-1, keepdims=True),
                                approx=approx_recip)

        # gaussian gate folded into the softmax exponent
        delta = j_pos - centers[:, h:h + 1]
        wg = jnp.exp((s - m) - delta * delta * inv_demon) * inv_den

        w_acc = w_acc + wg
        outs.append(jnp.dot(wg.astype(vh.dtype), vh,
                            preferred_element_type=jnp.float32))

    o_ref[0] = jnp.concatenate(outs, axis=-1).astype(o_ref.dtype)   # [tq, E]
    w_ref[0] = (w_acc * (1.0 / H)).astype(w_ref.dtype)              # fused avg


def pallas_local_attention(q4, k4, v4, c_bth, mask3, *, scaling, inv_demon,
                           approx_recip, out_dtype):
    tq, b, H, hd = q4.shape
    tk = k4.shape[0]
    E = H * hd
    kern = functools.partial(_attn_kernel, scaling=scaling,
                             inv_demon=inv_demon, approx_recip=approx_recip)
    return pl.pallas_call(
        kern,
        grid=(b,),
        in_specs=[
            pl.BlockSpec((tq, 1, H, hd), lambda i: (0, i, 0, 0)),
            pl.BlockSpec((tk, 1, H, hd), lambda i: (0, i, 0, 0)),
            pl.BlockSpec((tk, 1, H, hd), lambda i: (0, i, 0, 0)),
            pl.BlockSpec((1, tq, H), lambda i: (i, 0, 0)),
            pl.BlockSpec((1, 1, tk), lambda i: (i, 0, 0)),
        ],
        out_specs=[
            pl.BlockSpec((1, tq, E), lambda i: (i, 0, 0)),   # lane-dense output
            pl.BlockSpec((1, tq, tk), lambda i: (i, 0, 0)),  # head-averaged w
        ],
        out_shape=(
            jax.ShapeDtypeStruct((b, tq, E), out_dtype),
            jax.ShapeDtypeStruct((b, tq, tk), jnp.float32),
        ),
        compiler_params=pltpu.CompilerParams(
            dimension_semantics=("parallel",)),
    )(q4, k4, v4, c_bth, mask3)


# --------------------------------------------------------------------------
# Parameter init (deterministic, xavier-uniform like the module) + weight prep
# --------------------------------------------------------------------------
def xavier_uniform(key, shape):
    fan_out, fan_in = shape
    limit = (6.0 / (fan_in + fan_out)) ** 0.5
    return jax.random.uniform(key, shape, jnp.float32, -limit, limit)


def init_params(key, embed_dim, num_heads):
    ks = jax.random.split(key, 4)
    return dict(
        in_proj_weight=xavier_uniform(ks[0], (3 * embed_dim, embed_dim)),
        in_proj_bias=jnp.zeros((3 * embed_dim,), jnp.float32),
        local_proj_weight=xavier_uniform(ks[1], (embed_dim, embed_dim)),
        local_gate_proj_weight=xavier_uniform(ks[2], (num_heads, embed_dim)),
        out_proj_weight=xavier_uniform(ks[3], (embed_dim, embed_dim)),
        out_proj_bias=jnp.zeros((embed_dim,), jnp.float32),
    )


def prepare_params(params, compute_dtype):
    """One-time concat / transpose / cast of weights (hoisted out of forward)."""
    E = params["out_proj_weight"].shape[0]
    W = params["in_proj_weight"]            # [3E, E]
    bias = params["in_proj_bias"]           # [3E]
    return dict(
        wqc=jnp.concatenate([W[:E].T, params["local_proj_weight"].T],
                            axis=1).astype(compute_dtype),          # [E, 2E]
        bq=bias[:E].reshape(1, E).astype(jnp.float32),
        wg=params["local_gate_proj_weight"].T.astype(compute_dtype),  # [E, H]
        wkv=W[E:].T.astype(compute_dtype),                            # [E, 2E]
        bkv=bias[E:].reshape(1, 2 * E).astype(jnp.float32),
        wo=params["out_proj_weight"].T.astype(compute_dtype),         # [E, E]
        bo=params["out_proj_bias"].reshape(1, E).astype(jnp.float32),
    )


# --------------------------------------------------------------------------
# Forward (Pallas-backed)
# --------------------------------------------------------------------------
def luong_local_mha_forward(prep, query, key, value, key_padding_mask=None, *,
                            num_heads, local_span=10, approx_recip=True):
    """query: [tq, b, E]; key == value: [tk, b, E]; key_padding_mask: [b, tk]."""
    # kv_same path: value is identical to key (the module asserts kv_same)
    del value
    tq, b, E = query.shape
    tk = key.shape[0]
    H = num_heads
    hd = E // H
    scaling = hd ** -0.5
    inv_demon = 1.0 / (2.0 * (float(local_span) / 2.0) * 2.0)
    cdt = prep["wqc"].dtype

    x_q = query.reshape(tq * b, E).astype(cdt)
    x_k = key.reshape(tk * b, E).astype(cdt)

    # fused projections (each activation streamed from HBM exactly once)
    q2d, c2d = pallas_qproj(x_q, prep["wqc"], prep["bq"], prep["wg"],
                            out_dtype=cdt)                   # [tq*b,E], [tq*b,H]
    k2d, v2d = pallas_kvproj(x_k, prep["wkv"], prep["bkv"],
                             out_dtype=cdt)                  # [tk*b,E] x 2

    # free reshapes only: no XLA transposes of the big activations
    q4 = q2d.reshape(tq, b, H, hd)
    k4 = k2d.reshape(tk, b, H, hd)
    v4 = v2d.reshape(tk, b, H, hd)
    c_bth = c2d.reshape(tq, b, H).transpose(1, 0, 2)         # tiny [b, tq, H]
    if key_padding_mask is None:
        mask3 = jnp.zeros((b, 1, tk), jnp.float32)
    else:
        mask3 = key_padding_mask.astype(jnp.float32).reshape(b, 1, tk)

    attn_bte, attn_weights = pallas_local_attention(
        q4, k4, v4, c_bth, mask3, scaling=scaling, inv_demon=inv_demon,
        approx_recip=approx_recip, out_dtype=cdt)            # [b,tq,E], [b,tq,tk]

    out_flat = pallas_linear(attn_bte.reshape(b * tq, E), prep["wo"],
                             prep["bo"], out_dtype=jnp.float32)
    out = out_flat.reshape(b, tq, E).transpose(1, 0, 2)      # [tq, b, E]
    return out, attn_weights


# --------------------------------------------------------------------------
# Pure-JAX reference (mirrors the PyTorch forward) for verification
# --------------------------------------------------------------------------
def reference_forward(params, query, key, value, key_padding_mask=None,
                      *, num_heads, local_span=10):
    tq, b, E = query.shape
    tk = key.shape[0]
    H = num_heads
    hd = E // H
    scaling = hd ** -0.5
    demon = 2.0 * (float(local_span) / 2.0) * 2.0
    W = params["in_proj_weight"]
    bias = params["in_proj_bias"]
    q = query @ W[:E].T + bias[:E]
    k = key @ W[E:2 * E].T + bias[E:2 * E]
    v = value @ W[2 * E:].T + bias[2 * E:]
    q = q * scaling

    x = jnp.tanh(query @ params["local_proj_weight"].T) @ params["local_gate_proj_weight"].T
    if key_padding_mask is None:
        src_len = jnp.float32(tk)
    else:
        src_len = (tk - key_padding_mask.astype(jnp.float32).sum(-1, keepdims=True))[None]
    x = x * src_len
    x = x.reshape(tq, b * H).T[:, :, None]
    arange = jnp.arange(tk, dtype=jnp.float32)[None, None, :]
    gate = jnp.exp(-((arange - x) ** 2) / demon)

    qh = q.reshape(tq, b * H, hd).transpose(1, 0, 2)
    kh = k.reshape(tk, b * H, hd).transpose(1, 0, 2)
    vh = v.reshape(tk, b * H, hd).transpose(1, 0, 2)
    aw = jnp.einsum("bqd,bkd->bqk", qh, kh)
    if key_padding_mask is not None:
        m = key_padding_mask[:, None, None, :]
        aw = jnp.where(m, -jnp.inf, aw.reshape(b, H, tq, tk)).reshape(b * H, tq, tk)
    aw = jax.nn.softmax(aw, axis=-1)
    aw = aw * gate
    attn = jnp.einsum("bqk,bkd->bqd", aw, vh)
    attn = attn.transpose(1, 0, 2).reshape(tq, b, E)
    attn = attn @ params["out_proj_weight"].T + params["out_proj_bias"]
    aw = aw.reshape(b, H, tq, tk).sum(1) / H
    return attn, aw


# --------------------------------------------------------------------------
if __name__ == "__main__":
    embed_dim, num_heads = 32, 4
    tq, tk, bsz = 8, 8, 2

    root = jax.random.PRNGKey(0)
    kp, kq, kk_ = jax.random.split(root, 3)
    params = init_params(kp, embed_dim, num_heads)
    query = jax.random.normal(kq, (tq, bsz, embed_dim), jnp.float32)
    keyval = jax.random.normal(kk_, (tk, bsz, embed_dim), jnp.float32)
    # pad the last two source positions of batch 1
    key_padding_mask = jnp.zeros((bsz, tk), bool).at[1, tk - 2:].set(True)

    ref_out, ref_w = reference_forward(
        params, query, keyval, keyval, key_padding_mask,
        num_heads=num_heads, local_span=10)

    # 1) exact path (f32 MXU operands, exact reciprocal): strict semantic check
    prep32 = prepare_params(params, jnp.float32)
    out32, w32 = luong_local_mha_forward(
        prep32, query, keyval, keyval, key_padding_mask,
        num_heads=num_heads, local_span=10, approx_recip=False)
    out32 = jax.block_until_ready(out32)
    w32 = jax.block_until_ready(w32)
    np.testing.assert_allclose(np.asarray(out32), np.asarray(ref_out),
                               rtol=1e-3, atol=1e-3)
    np.testing.assert_allclose(np.asarray(w32), np.asarray(ref_w),
                               rtol=1e-3, atol=1e-3)

    # 2) performance path (bf16 MXU operands + approx reciprocal): loose check
    prep16 = prepare_params(params, jnp.bfloat16)
    out16, w16 = luong_local_mha_forward(
        prep16, query, keyval, keyval, key_padding_mask,
        num_heads=num_heads, local_span=10, approx_recip=True)
    out16 = jax.block_until_ready(out16)
    w16 = jax.block_until_ready(w16)
    np.testing.assert_allclose(np.asarray(out16), np.asarray(ref_out),
                               rtol=1e-1, atol=2e-1)
    np.testing.assert_allclose(np.asarray(w16), np.asarray(ref_w),
                               rtol=1e-1, atol=2e-1)

    print("KERNEL_OK")
</pallas_src>

<mosaic_0001>
module attributes {stable_mosaic.version = 11 : i64} {
  func.func @_qproj_kernel(%arg0: i32, %arg1: i32, %arg2: memref<16x32xf32, #tpu.memory_space<vmem>>, %arg3: memref<32x64xf32, #tpu.memory_space<vmem>>, %arg4: memref<1x32xf32, #tpu.memory_space<vmem>>, %arg5: memref<32x4xf32, #tpu.memory_space<vmem>>, %arg6: memref<16x32xf32, #tpu.memory_space<vmem>>, %arg7: memref<16x4xf32, #tpu.memory_space<vmem>>, %arg8: memref<16x64xf32, #tpu.memory_space<vmem>>) attributes {dimension_semantics = [#tpu.dimension_semantics<parallel>, #tpu.dimension_semantics<arbitrary>], iteration_bounds = array<i64: 1, 1>, scalar_prefetch = 0 : i64, scratch_operands = 1 : i64, tpu.core_type = #tpu.core_type<tc>, window_params = [{transform_indices = @transform_0, window_bounds = array<i64: 16, 32>}, {transform_indices = @transform_1, window_bounds = array<i64: 32, 64>}, {pipeline_mode = #tpu.pipeline_mode<synchronous>, transform_indices = @transform_2, window_bounds = array<i64: 1, 32>}, {pipeline_mode = #tpu.pipeline_mode<synchronous>, transform_indices = @transform_3, window_bounds = array<i64: 32, 4>}, {transform_indices = @transform_4, window_bounds = array<i64: 16, 32>}, {transform_indices = @transform_5, window_bounds = array<i64: 16, 4>}]} {
    %c0_i32 = arith.constant 0 : i32
    %0 = arith.cmpi eq, %arg1, %c0_i32 : i32
    %1 = arith.extui %0 : i1 to i32
    %c0_i32_0 = arith.constant 0 : i32
    %2 = arith.cmpi ne, %1, %c0_i32_0 : i32
    scf.if %2 {
      %cst_10 = arith.constant 0.000000e+00 : f32
      %12 = vector.broadcast %cst_10 : f32 to vector<16x64xf32>
      %c0_11 = arith.constant 0 : index
      %c0_12 = arith.constant 0 : index
      %13 = vector.load %arg8[%c0_11, %c0_12] : memref<16x64xf32, #tpu.memory_space<vmem>>, vector<16x64xf32>
      tpu.vector_store %arg8[%c0_11, %c0_12], %12 {strides = array<i32>} : memref<16x64xf32, #tpu.memory_space<vmem>>, vector<16x64xf32>,
    } else {
    }
    %c0 = arith.constant 0 : index
    %c0_1 = arith.constant 0 : index
    %3 = vector.load %arg8[%c0, %c0_1] : memref<16x64xf32, #tpu.memory_space<vmem>>, vector<16x64xf32>
    %c0_2 = arith.constant 0 : index
    %c0_3 = arith.constant 0 : index
    %4 = vector.load %arg2[%c0_2, %c0_3] : memref<16x32xf32, #tpu.memory_space<vmem>>, vector<16x32xf32>
    %c0_4 = arith.constant 0 : index
    %c0_5 = arith.constant 0 : index
    %5 = vector.load %arg3[%c0_4, %c0_5] : memref<32x64xf32, #tpu.memory_space<vmem>>, vector<32x64xf32>
    %cst = arith.constant dense<0.000000e+00> : vector<16x64xf32>
    %6 = tpu.matmul %4, %5, %cst {dimension_numbers = #tpu.dot_dimension_numbers<[1], [0], [0], [1], [0, 0, 1, 1], [], []>} : vector<16x32xf32>, vector<32x64xf32>, vector<16x64xf32> -> vector<16x64xf32>
    %7 = arith.addf %3, %6 : vector<16x64xf32>
    %c0_6 = arith.constant 0 : index
    %c0_7 = arith.constant 0 : index
    %8 = vector.load %arg8[%c0_6, %c0_7] : memref<16x64xf32, #tpu.memory_space<vmem>>, vector<16x64xf32>
    tpu.vector_store %arg8[%c0_6, %c0_7], %7 {strides = array<i32>} : memref<16x64xf32, #tpu.memory_space<vmem>>, vector<16x64xf32>,
    %c0_i32_8 = arith.constant 0 : i32
    %9 = arith.cmpi eq, %arg1, %c0_i32_8 : i32
    %10 = arith.extui %9 : i1 to i32
    %c0_i32_9 = arith.constant 0 : i32
    %11 = arith.cmpi ne, %10, %c0_i32_9 : i32
    scf.if %11 {
      %c0_10 = arith.constant 0 : index
      %c0_11 = arith.constant 0 : index
      %12 = vector.load %arg8[%c0_10, %c0_11] : memref<16x64xf32, #tpu.memory_space<vmem>>, vector<16x64xf32>
      %13 = vector.extract_strided_slice %12 {offsets = [0, 0], sizes = [16, 32], strides = [1, 1]} : vector<16x64xf32> to vector<16x32xf32>
      %c0_12 = arith.constant 0 : index
      %c0_13 = arith.constant 0 : index
      %14 = vector.load %arg4[%c0_12, %c0_13] : memref<1x32xf32, #tpu.memory_space<vmem>>, vector<1x32xf32>
      %15 = vector.broadcast %14 : vector<1x32xf32> to vector<16x32xf32>
      %16 = arith.addf %13, %15 : vector<16x32xf32>
      %c0_14 = arith.constant 0 : index
      %c0_15 = arith.constant 0 : index
      %17 = vector.load %arg6[%c0_14, %c0_15] : memref<16x32xf32, #tpu.memory_space<vmem>>, vector<16x32xf32>
      tpu.vector_store %arg6[%c0_14, %c0_15], %16 {strides = array<i32>} : memref<16x32xf32, #tpu.memory_space<vmem>>, vector<16x32xf32>,
      %18 = vector.extract_strided_slice %12 {offsets = [0, 32], sizes = [16, 32], strides = [1, 1]} : vector<16x64xf32> to vector<16x32xf32>
      %19 = math.tanh %18 : vector<16x32xf32>
      %c0_16 = arith.constant 0 : index
      %c0_17 = arith.constant 0 : index
      %20 = vector.load %arg5[%c0_16, %c0_17] : memref<32x4xf32, #tpu.memory_space<vmem>>, vector<32x4xf32>
      %cst_18 = arith.constant dense<0.000000e+00> : vector<16x4xf32>
      %21 = tpu.matmul %19, %20, %cst_18 {dimension_numbers = #tpu.dot_dimension_numbers<[1], [0], [0], [1], [0, 0, 1, 1], [], []>} : vector<16x32xf32>, vector<32x4xf32>, vector<16x4xf32> -> vector<16x4xf32>
      %c0_19 = arith.constant 0 : index
      %c0_20 = arith.constant 0 : index
      %22 = vector.load %arg7[%c0_19, %c0_20] : memref<16x4xf32, #tpu.memory_space<vmem>>, vector<16x4xf32>
      tpu.vector_store %arg7[%c0_19, %c0_20], %21 {strides = array<i32>} : memref<16x4xf32, #tpu.memory_space<vmem>>, vector<16x4xf32>,
    } else {
    }
    return
  }
  func.func @transform_0(%arg0: i32, %arg1: i32) -> (i32, i32) {
    %c0_i32 = arith.constant 0 : i32
    return %arg0, %arg1 : i32, i32
  }
  func.func @transform_1(%arg0: i32, %arg1: i32) -> (i32, i32) {
    %c0_i32 = arith.constant 0 : i32
    %c0_i32_0 = arith.constant 0 : i32
    return %arg1, %c0_i32 : i32, i32
  }
  func.func @transform_2(%arg0: i32, %arg1: i32) -> (i32, i32) {
    %c0_i32 = arith.constant 0 : i32
    %c0_i32_0 = arith.constant 0 : i32
    %c0_i32_1 = arith.constant 0 : i32
    return %c0_i32, %c0_i32_0 : i32, i32
  }
  func.func @transform_3(%arg0: i32, %arg1: i32) -> (i32, i32) {
    %c0_i32 = arith.constant 0 : i32
    %c0_i32_0 = arith.constant 0 : i32
    %c0_i32_1 = arith.constant 0 : i32
    return %c0_i32, %c0_i32_0 : i32, i32
  }
  func.func @transform_4(%arg0: i32, %arg1: i32) -> (i32, i32) {
    %c0_i32 = arith.constant 0 : i32
    %c0_i32_0 = arith.constant 0 : i32
    return %arg0, %c0_i32 : i32, i32
  }
  func.func @transform_5(%arg0: i32, %arg1: i32) -> (i32, i32) {
    %c0_i32 = arith.constant 0 : i32
    %c0_i32_0 = arith.constant 0 : i32
    return %arg0, %c0_i32 : i32, i32
  }
}

</mosaic_0001>

<bundles_post_ra>
// kernel: tpu_custom_call.1
= control target key start
LH: loop header
LB: loop body
LE: loop exit
PB: predicated region body
PF: predicated region fallthrough
CT: control target
= control target key end

     0   :  { %11 = vsyncpa [#allocation4], 0  ;;  %s489_s0 = inlined_call_operand.hbm [shape: f32[16,32], index: 0, kind: input, shape index: {}]   ;;  %s490_s1 = inlined_call_operand.vmem [shape: f32[32,64], index: 1, kind: input, shape index: {}]   ;;  %s491_s2 = inlined_call_operand.vmem [shape: f32[1,32], index: 2, kind: input, shape index: {}]   ;;  %s492_s3 = inlined_call_operand.vmem [shape: f32[32,4], index: 3, kind: input, shape index: {}]   ;;  %s493_s4 = inlined_call_operand.hbm [shape: f32[16,32], index: 4, kind: output, shape index: {0}]   ;;  %s494_s5 = inlined_call_operand.vmem [shape: f32[16,4], index: 5, kind: output, shape index: {1}]  }
   0x1   :  { %12 = vsyncpa [#allocation5], 0  ;;  %s380_s18 = smov [#allocation3]   ;;  %s332_s22 = scalar_lea.hbm %s489_s0, 256 }
   0x2   :  { %s18_s19 = sshll.u32 %s380_s18, 4  ;;  %p333_p0 = scmp.ne.s32.totalorder %s489_s0, %s332_s22  ;;  %s19_s19 = int_to_ptr.vmem [resolvable:$true] %s18_s19 }
   0x3   :  { %p336_p1 = scmp.lt.u32.totalorder %s332_s22, %s489_s0 }
   0x5   :  { %p338_p2 = pnand %p336_p1, %p333_p0 }
   0x7   :  { %341 = shalt.err (!%p338_p2)
}
   0x8   :  { %s342_s27 = scalar_lea.vmem %s19_s19, 256  ;;  %p347_p4 = scmp.lt.s32.totalorder %s19_s19, %s19_s19 }
   0x9   :  { %p343_p3 = scmp.ne.s32.totalorder %s19_s19, %s342_s27  ;;  %p348_p5 = scmp.lt.s32.totalorder %s342_s27, %s342_s27 }
   0xb   :  { %p349_p6 = por %p348_p5, %p347_p4 }
   0xd   :  { %p350_p7 = pnand %p349_p6, %p343_p3 }
   0xf   :  { %353 = shalt.err (!%p350_p7)
}
  0x10   :  { %s381_s28 = smov 128   ;;  %s382_s29 = smov 8  }
  0x11   :  { %24 = dma.hbm_to_vmem [thread:$0]  %s489_s0, 256, %s19_s19, [#allocation4], %s381_s28, %s381_s28, %s382_s29  }
  0x12   :  { %376 = dma.done.wait [#allocation4], 256  }
  0x13   :  { %377 = vsyncadd [#allocation4], 4294967040  ;;  %vm38_vm0 = vcmask 523264   ;;  %v383_v0 = vmov 0.0   ;;  %vm49_vm1 = vcmask 261120   ;;  %v45_v1 = vld [vmem:[%s490_s1] sm:$0xff] }
  0x14   :  { %40 = vst.msk [vmem:[#allocation2 + $0x8] sm:$0xff] %vm38_vm0, %v383_v0  ;;  %39 = vst.msk [vmem:[#allocation2] sm:$0xff] %vm38_vm0, %v383_v0  ;;  %v46_v2 = vld [vmem:[%s490_s1 + $0x8] sm:$0xff]  ;;  %v47_v3 = vld [vmem:[%s490_s1 + $0x10] sm:$0xff]  ;;  %s384_s23 = smov 96  }
  0x15   :  { %v306_v4 = vpack.c.bf16 %v46_v2, %v45_v1  ;;  %v48_v5 = vld [vmem:[%s490_s1 + $0x18] sm:$0xff]  ;;  %v43_v6 = vld [vmem:[#allocation3] sm:$0xff]  ;;  %v154_v9 = vld [vmem:[%s492_s3] sm:$0xff] }
  0x16   :  { %v310_v7 = vpack.c.bf16 %v48_v5, %v47_v3  ;;  %292 = vmatprep.mubr.msk.f32.mxu0 %vm49_vm1, %v43_v6  ;;  %v44_v8 = vld [vmem:[#allocation3 + $0x8] sm:$0xff]  ;;  %v155_v10 = vld [vmem:[%s492_s3 + $0x8] sm:$0xff]  ;;  %v156_v18 = vld [vmem:[%s492_s3 + $0x10] sm:$0xff] }
  0x17   :  { %307 = vmatprep.subr.bf16.mxu0 %v306_v4  ;;  %v314_v11 = vpack.c.bf16 %v155_v10, %v154_v9  ;;  %v157_v19 = vld [vmem:[%s492_s3 + $0x18] sm:$0xff]  ;;  %v269_v21 = vld [vmem:[%s491_s2] ss:$0 sm:$0xff]  ;;  %s385_s2 = smov [#allocation6]  }
  0x18   :  { %309 = vmatpush3.bf16.msra.mxu0 %v306_v4  ;;  %v318_v20 = vpack.c.bf16 %v157_v19, %v156_v18  ;;  %s251_s3 = sshll.u32 %s385_s2, 4  ;;  %s252_s3 = int_to_ptr.vmem [resolvable:$true] %s251_s3 }
  0x19   :  { %311 = vmatprep.subr.bf16.mxu0 %v310_v7  ;;  %315 = vmatprep.subr.bf16.mxu1 %v314_v11  ;;  %s354_s24 = scalar_lea.vmem %s252_s3, 256  ;;  %p359_p9 = scmp.lt.s32.totalorder %s252_s3, %s252_s3 }
  0x1a   :  { %317 = vmatpush3.bf16.msra.mxu1 %v314_v11  ;;  %p355_p8 = scmp.ne.s32.totalorder %s252_s3, %s354_s24  ;;  %p360_p10 = scmp.lt.s32.totalorder %s354_s24, %s354_s24 }
  0x1b   :  { %v42_v12 = vld [vmem:[#allocation2 + $0x8] sm:$0xff]  ;;  %v41_v13 = vld [vmem:[#allocation2] sm:$0xff]  ;;  %319 = vmatprep.subr.bf16.mxu1 %v318_v20 }
  0x1c   :  { %313 = vmatpush3.bf16.msra.mxu0 %v310_v7  ;;  %p361_p11 = por %p360_p10, %p359_p9 }
  0x1e   :  { %321 = vmatpush3.bf16.msra.mxu1 %v318_v20  ;;  %p362_p12 = pnand %p361_p11, %p355_p8 }
  0x1f   :  { %293 = vmatmul.mubr.msk.f32.vlgmr.msra.gmra.mrb[0].mxu0 %vm49_vm1, %v44_v8 }
  0xf2   :  { %v294_v14 = vpop.f32.mrb[0].mxu0 }
  0xf3   :  { %v132_v15 = vadd.f32 %v294_v14, %v42_v12  ;;  %v122_v16 = vpop.f32.mrb[1].mxu0 }
  0xf4   :  { %v131_v17 = vadd.f32 %v122_v16, %v41_v13 }
  0xf5   :  { %135 = vst.msk [vmem:[#allocation2 + $0x8] sm:$0xff] %vm38_vm0, %v132_v15 }
  0xf6   :  { %134 = vst.msk [vmem:[#allocation2] sm:$0xff] %vm38_vm0, %v131_v17 }
  0xfc   :  { %v140_v22 = vld [vmem:[#allocation2 + $0x8] sm:$0xff] }
  0xfd   :  { %v139_v23 = vld [vmem:[#allocation2] sm:$0xff]  ;;  %v149_v24 = vadd.f32 %v269_v21, %v140_v22 }
  0xfe   :  { %328 = vtanh.f32 %v139_v23  ;;  %v148_v25 = vadd.f32 %v269_v21, %v139_v23 }
  0xff   :  { %151 = vst.msk [vmem:[#allocation6 + $0x8] sm:$0xff] %vm49_vm1, %v149_v24  ;;  %330 = vtanh.f32 %v140_v22 }
 0x100   :  { %150 = vst.msk [vmem:[#allocation6] sm:$0xff] %vm49_vm1, %v148_v25 }
 0x108   :  { %v329_v26 = vpop.eup %328 }
 0x109   :  { %160 = vrot.lane.b32.xlu0 %v329_v26, %s384_s23  ;;  %v331_v27 = vpop.eup %330 }
 0x10d   :  { %162 = vrot.lane.b32.xlu0 %v331_v27, %s384_s23 }
 0x17b   :  { %v161_v28 = vpop.permute.xlu0 %160 }
 0x17c   :  { %303 = vmatprep.mubr.msk.f32.mxu1 %vm49_vm1, %v161_v28 }
 0x17f   :  { %v163_v29 = vpop.permute.xlu0 %162 }
 0x180   :  { %304 = vmatmul.mubr.msk.f32.vlgmr.msra.gmra.mrb[0].mxu1 %vm49_vm1, %v163_v29 }
 0x181   :  { %365 = shalt.err (!%p362_p12)
}
 0x182   :  { %s366_s27 = scalar_lea.hbm %s493_s4, 256 }
 0x183   :  { %p367_p13 = scmp.ne.s32.totalorder %s493_s4, %s366_s27  ;;  %p370_p0 = scmp.lt.u32.totalorder %s366_s27, %s493_s4 }
 0x185   :  { %p372_p1 = pnand %p370_p0, %p367_p13 }
 0x187   :  { %375 = shalt.err (!%p372_p1)
}
 0x188   :  { %257 = dma.vmem_to_hbm [thread:$0]  %s252_s3, 256, %s493_s4, [#allocation5], %s381_s28, %s381_s28, %s382_s29   ;;  %vm243_vm2 = vcmask 31744  }
 0x253   :  { %v305_v30 = vpop.f32.mrb[0].mxu1 }
 0x254   :  { %245 = vst.msk [vmem:[%s494_s5 + $0x8] sm:$0xff] %vm243_vm2, %v305_v30  ;;  %v234_v31 = vpop.f32.mrb[1].mxu1 }
 0x255   :  { %244 = vst.msk [vmem:[%s494_s5] sm:$0xff] %vm243_vm2, %v234_v31 }
 0x256   :  { %378 = dma.done.wait [#allocation5], 256  }
 0x257   :  { %379 = vsyncadd [#allocation5], 4294967040 }
 0x258   :  { %265 = vsyncpa [#allocation4], 1 }
 0x259   :  { %266 = vsyncpa [#allocation5], 1 }

</bundles_post_ra>
